<compile_context>
chip_gen: v6e
topology: v6e:2x2x1
jax: 0.10.0
libtpu: 0.0.40
codegen_flags: <defaults>
</compile_context>

<pallas_src>
import jax
import jax.numpy as jnp
from jax import lax
from jax.experimental import pallas as pl
from jax.experimental.pallas import tpu as pltpu


# ----------------------------------------------------------------------------
# MobileNetV3-Small feature extractor (plain JAX glue: convs / BN / SE), NHWC.
# TODO(synk): the pretrained MobileNetV3 backbone (conv/BN/SE stack + its
# checkpoint) has no clean single-Pallas-kernel equivalent; it is reproduced
# structurally in plain JAX with deterministic random weights.
# ----------------------------------------------------------------------------

def _make_divisible(v, divisor=8):
    new_v = max(divisor, int(v + divisor / 2) // divisor * divisor)
    if new_v < 0.9 * v:
        new_v += divisor
    return new_v


def hardswish(x):
    return x * jnp.clip(x + 3.0, 0.0, 6.0) / 6.0


def hardsigmoid(x):
    return jnp.clip(x + 3.0, 0.0, 6.0) / 6.0


def relu(x):
    return jnp.maximum(x, 0.0)


def conv2d(x, w, stride=1, padding=0, groups=1):
    # NHWC activations, HWIO weights -> native TPU-friendly layout.
    return lax.conv_general_dilated(
        x, w, (stride, stride),
        ((padding, padding), (padding, padding)),
        dimension_numbers=("NHWC", "HWIO", "NHWC"),
        feature_group_count=groups)


def batchnorm(x, eps=1e-3):
    # eval-mode BN with deterministic stats: mean=0, var=1, gamma=1, beta=0
    return x / jnp.sqrt(1.0 + eps)


# (in_c, kernel, expanded_c, out_c, use_se, activation, stride) -- torchvision cfg
BNECK_CFG = [
    (16, 3, 16, 16, True, "RE", 2),
    (16, 3, 72, 24, False, "RE", 2),
    (24, 3, 88, 24, False, "RE", 1),
    (24, 5, 96, 40, True, "HS", 2),
    (40, 5, 240, 40, True, "HS", 1),
    (40, 5, 240, 40, True, "HS", 1),
    (40, 5, 120, 48, True, "HS", 1),
    (48, 5, 144, 48, True, "HS", 1),
    (48, 5, 288, 96, True, "HS", 2),
    (96, 5, 576, 96, True, "HS", 1),
    (96, 5, 576, 96, True, "HS", 1),
]


def _conv_w(key, out_c, in_c_per_group, k):
    # HWIO layout for NHWC convs.
    fan_in = max(in_c_per_group * k * k, 1)
    return (jax.random.normal(key, (k, k, in_c_per_group, out_c), jnp.float32)
            / jnp.sqrt(float(fan_in)))


def init_backbone(key):
    keys = iter(jax.random.split(key, 256))
    params = {"stem": _conv_w(next(keys), 16, 3, 3), "blocks": []}
    for (cin, k, exp, cout, use_se, act, stride) in BNECK_CFG:
        b = {}
        if exp != cin:
            b["expand"] = _conv_w(next(keys), exp, cin, 1)
        b["dw"] = _conv_w(next(keys), exp, 1, k)  # depthwise (groups = exp)
        if use_se:
            sq = _make_divisible(exp // 4)
            b["se_fc1_w"] = _conv_w(next(keys), sq, exp, 1)
            b["se_fc1_b"] = jnp.zeros((sq,), jnp.float32)
            b["se_fc2_w"] = _conv_w(next(keys), exp, sq, 1)
            b["se_fc2_b"] = jnp.zeros((exp,), jnp.float32)
        b["project"] = _conv_w(next(keys), cout, exp, 1)
        params["blocks"].append(b)
    params["last"] = _conv_w(next(keys), 576, 96, 1)
    return params


def feature_extractor(params, x_nhwc):
    # stem: conv3x3 s2 -> BN -> hardswish
    y = hardswish(batchnorm(conv2d(x_nhwc, params["stem"], stride=2, padding=1)))
    for b, (cin, k, exp, cout, use_se, act, stride) in zip(params["blocks"], BNECK_CFG):
        act_fn = hardswish if act == "HS" else relu
        inp = y
        h = y
        if "expand" in b:
            h = act_fn(batchnorm(conv2d(h, b["expand"], 1, 0)))
        pad = (k - 1) // 2
        h = act_fn(batchnorm(conv2d(h, b["dw"], stride, pad, groups=exp)))
        if use_se:
            s = jnp.mean(h, axis=(1, 2), keepdims=True)          # [N,1,1,C]
            s = relu(conv2d(s, b["se_fc1_w"], 1, 0)
                     + b["se_fc1_b"][None, None, None, :])
            s = conv2d(s, b["se_fc2_w"], 1, 0) + b["se_fc2_b"][None, None, None, :]
            h = h * hardsigmoid(s)
        h = batchnorm(conv2d(h, b["project"], 1, 0))
        if stride == 1 and cin == cout:
            h = h + inp
        y = h
    y = hardswish(batchnorm(conv2d(y, params["last"], 1, 0)))
    # global average pool + flatten; classifier is Identity -> [N, 576]
    return jnp.mean(y, axis=(1, 2))


# ----------------------------------------------------------------------------
# Pallas TPU kernel: fused MLP head (Linear+ReLU -> Linear+ReLU -> Linear)
# ----------------------------------------------------------------------------

F_IN = 576        # true feature width
F_PAD = 640       # padded K (multiple of 128) -> lane-dense first matmul
H1 = 256
H2 = 128
OUT = 2           # true output width
OUT_PAD = 128     # lane-dense output width (slice [:, :2] in the wrapper)


def _head_kernel(x_ref, w1_ref, b1_ref, w2_ref, b2_ref, w3_ref, b3_ref, o_ref):
    # bf16 MXU operands, f32 accumulation; bias+ReLU in f32 (v5e-safe).
    h = jnp.dot(x_ref[...], w1_ref[...], preferred_element_type=jnp.float32)
    h = jnp.maximum(h + b1_ref[...], 0.0)
    h = jnp.dot(h.astype(jnp.bfloat16), w2_ref[...],
                preferred_element_type=jnp.float32)
    h = jnp.maximum(h + b2_ref[...], 0.0)
    o_ref[...] = (jnp.dot(h.astype(jnp.bfloat16), w3_ref[...],
                          preferred_element_type=jnp.float32)
                  + b3_ref[...])


def _round_up(v, m):
    return ((v + m - 1) // m) * m


def mlp_head(x, w1, b1, w2, b2, w3, b3, *, max_tile_m=512):
    """x: [N, 576] f32 -> [N, 2] f32 via a fused, batch-tiled Pallas kernel."""
    n = x.shape[0]
    # Tile height: at least one sublane group (8), at most max_tile_m rows.
    tile_m = min(max_tile_m, _round_up(max(n, 1), 8))
    n_pad = _round_up(n, tile_m)

    # Pad batch + feature dims; cast matmul operands to bf16 (f32 biases).
    x_p = jnp.pad(x, ((0, n_pad - n), (0, F_PAD - F_IN))).astype(jnp.bfloat16)
    w1b = w1.astype(jnp.bfloat16)
    w2b = w2.astype(jnp.bfloat16)
    w3b = w3.astype(jnp.bfloat16)

    grid = (n_pad // tile_m,)
    out = pl.pallas_call(
        _head_kernel,
        out_shape=jax.ShapeDtypeStruct((n_pad, OUT_PAD), jnp.float32),
        grid=grid,
        in_specs=[
            # activation tile: streamed / double-buffered along the batch grid
            pl.BlockSpec((tile_m, F_PAD), lambda i: (i, 0)),
            # weights & biases: constant index_map -> VMEM-resident across steps
            pl.BlockSpec((F_PAD, H1), lambda i: (0, 0)),
            pl.BlockSpec((1, H1), lambda i: (0, 0)),
            pl.BlockSpec((H1, H2), lambda i: (0, 0)),
            pl.BlockSpec((1, H2), lambda i: (0, 0)),
            pl.BlockSpec((H2, OUT_PAD), lambda i: (0, 0)),
            pl.BlockSpec((1, OUT_PAD), lambda i: (0, 0)),
        ],
        out_specs=pl.BlockSpec((tile_m, OUT_PAD), lambda i: (i, 0)),
        compiler_params=pltpu.CompilerParams(
            dimension_semantics=("parallel",)),
    )(x_p, w1b, b1, w2b, b2, w3b, b3)
    return out[:n, :OUT]


def init_head(key):
    k1, k2, k3, k4, k5, k6 = jax.random.split(key, 6)
    # PyTorch Linear stores [out, in]; we init directly in [in, out] layout.
    # w1 padded on the K axis (576->640, zero rows), w3/b3 padded on the
    # output axis (2->128, zero cols) for lane-dense MXU / store paths.
    w1 = jax.random.normal(k1, (F_IN, H1), jnp.float32) / jnp.sqrt(float(F_IN))
    w1 = jnp.pad(w1, ((0, F_PAD - F_IN), (0, 0)))
    b1 = jax.random.normal(k2, (1, H1), jnp.float32) * 0.01
    w2 = jax.random.normal(k3, (H1, H2), jnp.float32) / jnp.sqrt(float(H1))
    b2 = jax.random.normal(k4, (1, H2), jnp.float32) * 0.01
    w3 = jax.random.normal(k5, (H2, OUT), jnp.float32) / jnp.sqrt(float(H2))
    w3 = jnp.pad(w3, ((0, 0), (0, OUT_PAD - OUT)))
    b3 = jax.random.normal(k6, (1, OUT), jnp.float32) * 0.01
    b3 = jnp.pad(b3, ((0, 0), (0, OUT_PAD - OUT)))
    return (w1, b1, w2, b2, w3, b3)


def network_forward(backbone_params, head_params, x_nchw):
    # Public interface matches PyTorch (NCHW); transpose once to NHWC.
    x_nhwc = jnp.transpose(x_nchw, (0, 2, 3, 1))
    feats = feature_extractor(backbone_params, x_nhwc)   # [N, 576]
    return mlp_head(feats, *head_params)                 # [N, 2]


if __name__ == "__main__":
    key = jax.random.PRNGKey(0)
    kx, kb, kh = jax.random.split(key, 3)

    # NCHW image input (5 stride-2 stages -> 1x1 spatial at 32x32)
    x = jax.random.normal(kx, (2, 3, 32, 32), jnp.float32)

    backbone_params = init_backbone(kb)
    head_params = init_head(kh)

    fwd = jax.jit(lambda xx: network_forward(backbone_params, head_params, xx))
    out = fwd(x)
    jax.block_until_ready(out)

    assert out.shape == (2, 2) and out.dtype == jnp.float32
    assert bool(jnp.all(jnp.isfinite(out)))
    print("KERNEL_OK")
</pallas_src>

<mosaic_0001>
module attributes {stable_mosaic.version = 11 : i64} {
  func.func @_head_kernel(%arg0: i32, %arg1: memref<8x640xbf16, #tpu.memory_space<vmem>>, %arg2: memref<640x256xbf16, #tpu.memory_space<vmem>>, %arg3: memref<1x256xf32, #tpu.memory_space<vmem>>, %arg4: memref<256x128xbf16, #tpu.memory_space<vmem>>, %arg5: memref<1x128xf32, #tpu.memory_space<vmem>>, %arg6: memref<128x128xbf16, #tpu.memory_space<vmem>>, %arg7: memref<1x128xf32, #tpu.memory_space<vmem>>, %arg8: memref<8x128xf32, #tpu.memory_space<vmem>>) attributes {dimension_semantics = [#tpu.dimension_semantics<parallel>], iteration_bounds = array<i64: 1>, scalar_prefetch = 0 : i64, scratch_operands = 0 : i64, tpu.core_type = #tpu.core_type<tc>, window_params = [{transform_indices = @transform_0, window_bounds = array<i64: 8, 640>}, {pipeline_mode = #tpu.pipeline_mode<synchronous>, transform_indices = @transform_1, window_bounds = array<i64: 640, 256>}, {pipeline_mode = #tpu.pipeline_mode<synchronous>, transform_indices = @transform_2, window_bounds = array<i64: 1, 256>}, {pipeline_mode = #tpu.pipeline_mode<synchronous>, transform_indices = @transform_3, window_bounds = array<i64: 256, 128>}, {pipeline_mode = #tpu.pipeline_mode<synchronous>, transform_indices = @transform_4, window_bounds = array<i64: 1, 128>}, {pipeline_mode = #tpu.pipeline_mode<synchronous>, transform_indices = @transform_5, window_bounds = array<i64: 128, 128>}, {pipeline_mode = #tpu.pipeline_mode<synchronous>, transform_indices = @transform_6, window_bounds = array<i64: 1, 128>}, {transform_indices = @transform_7, window_bounds = array<i64: 8, 128>}]} {
    %c0 = arith.constant 0 : index
    %c0_0 = arith.constant 0 : index
    %0 = vector.load %arg1[%c0, %c0_0] : memref<8x640xbf16, #tpu.memory_space<vmem>>, vector<8x640xbf16>
    %c0_1 = arith.constant 0 : index
    %c0_2 = arith.constant 0 : index
    %1 = vector.load %arg2[%c0_1, %c0_2] : memref<640x256xbf16, #tpu.memory_space<vmem>>, vector<640x256xbf16>
    %cst = arith.constant dense<0.000000e+00> : vector<8x256xf32>
    %2 = tpu.matmul %0, %1, %cst {dimension_numbers = #tpu.dot_dimension_numbers<[1], [0], [0], [1], [0, 0, 1, 1], [], []>} : vector<8x640xbf16>, vector<640x256xbf16>, vector<8x256xf32> -> vector<8x256xf32>
    %c0_3 = arith.constant 0 : index
    %c0_4 = arith.constant 0 : index
    %3 = vector.load %arg3[%c0_3, %c0_4] : memref<1x256xf32, #tpu.memory_space<vmem>>, vector<1x256xf32>
    %4 = vector.broadcast %3 : vector<1x256xf32> to vector<8x256xf32>
    %5 = arith.addf %2, %4 : vector<8x256xf32>
    %cst_5 = arith.constant 0.000000e+00 : f32
    %6 = vector.broadcast %cst_5 : f32 to vector<8x256xf32>
    %7 = arith.maximumf %5, %6 : vector<8x256xf32>
    %8 = arith.truncf %7 : vector<8x256xf32> to vector<8x256xbf16>
    %c0_6 = arith.constant 0 : index
    %c0_7 = arith.constant 0 : index
    %9 = vector.load %arg4[%c0_6, %c0_7] : memref<256x128xbf16, #tpu.memory_space<vmem>>, vector<256x128xbf16>
    %cst_8 = arith.constant dense<0.000000e+00> : vector<8x128xf32>
    %10 = tpu.matmul %8, %9, %cst_8 {dimension_numbers = #tpu.dot_dimension_numbers<[1], [0], [0], [1], [0, 0, 1, 1], [], []>} : vector<8x256xbf16>, vector<256x128xbf16>, vector<8x128xf32> -> vector<8x128xf32>
    %c0_9 = arith.constant 0 : index
    %c0_10 = arith.constant 0 : index
    %11 = vector.load %arg5[%c0_9, %c0_10] : memref<1x128xf32, #tpu.memory_space<vmem>>, vector<1x128xf32>
    %12 = vector.broadcast %11 : vector<1x128xf32> to vector<8x128xf32>
    %13 = arith.addf %10, %12 : vector<8x128xf32>
    %cst_11 = arith.constant 0.000000e+00 : f32
    %14 = vector.broadcast %cst_11 : f32 to vector<8x128xf32>
    %15 = arith.maximumf %13, %14 : vector<8x128xf32>
    %16 = arith.truncf %15 : vector<8x128xf32> to vector<8x128xbf16>
    %c0_12 = arith.constant 0 : index
    %c0_13 = arith.constant 0 : index
    %17 = vector.load %arg6[%c0_12, %c0_13] : memref<128x128xbf16, #tpu.memory_space<vmem>>, vector<128x128xbf16>
    %cst_14 = arith.constant dense<0.000000e+00> : vector<8x128xf32>
    %18 = tpu.matmul %16, %17, %cst_14 {dimension_numbers = #tpu.dot_dimension_numbers<[1], [0], [0], [1], [0, 0, 1, 1], [], []>} : vector<8x128xbf16>, vector<128x128xbf16>, vector<8x128xf32> -> vector<8x128xf32>
    %c0_15 = arith.constant 0 : index
    %c0_16 = arith.constant 0 : index
    %19 = vector.load %arg7[%c0_15, %c0_16] : memref<1x128xf32, #tpu.memory_space<vmem>>, vector<1x128xf32>
    %20 = vector.broadcast %19 : vector<1x128xf32> to vector<8x128xf32>
    %21 = arith.addf %18, %20 : vector<8x128xf32>
    %c0_17 = arith.constant 0 : index
    %c0_18 = arith.constant 0 : index
    %22 = vector.load %arg8[%c0_17, %c0_18] : memref<8x128xf32, #tpu.memory_space<vmem>>, vector<8x128xf32>
    tpu.vector_store %arg8[%c0_17, %c0_18], %21 {strides = array<i32>} : memref<8x128xf32, #tpu.memory_space<vmem>>, vector<8x128xf32>,
    return
  }
  func.func @transform_0(%arg0: i32) -> (i32, i32) {
    %c0_i32 = arith.constant 0 : i32
    %c0_i32_0 = arith.constant 0 : i32
    return %arg0, %c0_i32 : i32, i32
  }
  func.func @transform_1(%arg0: i32) -> (i32, i32) {
    %c0_i32 = arith.constant 0 : i32
    %c0_i32_0 = arith.constant 0 : i32
    %c0_i32_1 = arith.constant 0 : i32
    return %c0_i32, %c0_i32_0 : i32, i32
  }
  func.func @transform_2(%arg0: i32) -> (i32, i32) {
    %c0_i32 = arith.constant 0 : i32
    %c0_i32_0 = arith.constant 0 : i32
    %c0_i32_1 = arith.constant 0 : i32
    return %c0_i32, %c0_i32_0 : i32, i32
  }
  func.func @transform_3(%arg0: i32) -> (i32, i32) {
    %c0_i32 = arith.constant 0 : i32
    %c0_i32_0 = arith.constant 0 : i32
    %c0_i32_1 = arith.constant 0 : i32
    return %c0_i32, %c0_i32_0 : i32, i32
  }
  func.func @transform_4(%arg0: i32) -> (i32, i32) {
    %c0_i32 = arith.constant 0 : i32
    %c0_i32_0 = arith.constant 0 : i32
    %c0_i32_1 = arith.constant 0 : i32
    return %c0_i32, %c0_i32_0 : i32, i32
  }
  func.func @transform_5(%arg0: i32) -> (i32, i32) {
    %c0_i32 = arith.constant 0 : i32
    %c0_i32_0 = arith.constant 0 : i32
    %c0_i32_1 = arith.constant 0 : i32
    return %c0_i32, %c0_i32_0 : i32, i32
  }
  func.func @transform_6(%arg0: i32) -> (i32, i32) {
    %c0_i32 = arith.constant 0 : i32
    %c0_i32_0 = arith.constant 0 : i32
    %c0_i32_1 = arith.constant 0 : i32
    return %c0_i32, %c0_i32_0 : i32, i32
  }
  func.func @transform_7(%arg0: i32) -> (i32, i32) {
    %c0_i32 = arith.constant 0 : i32
    %c0_i32_0 = arith.constant 0 : i32
    return %arg0, %c0_i32 : i32, i32
  }
}

</mosaic_0001>

<bundles_post_ra>
// kernel: _lambda_.1
= control target key start
LH: loop header
LB: loop body
LE: loop exit
PB: predicated region body
PF: predicated region fallthrough
CT: control target
= control target key end

     0   :  { %vm1276_vm0 = vmmov 0   ;;  %s1650_s1 = inlined_call_operand.vmem [shape: bf16[640,256], index: 1, kind: input, shape index: {}]   ;;  %s1651_s0 = inlined_call_operand.vmem [shape: bf16[8,640], index: 0, kind: input, shape index: {}]   ;;  %s1652_s3 = inlined_call_operand.vmem [shape: bf16[256,128], index: 3, kind: input, shape index: {}]   ;;  %s1653_s5 = inlined_call_operand.vmem [shape: bf16[128,128], index: 5, kind: input, shape index: {}]   ;;  %s1654_s2 = inlined_call_operand.vmem [shape: f32[1,256], index: 2, kind: input, shape index: {}]   ;;  %s1655_s4 = inlined_call_operand.vmem [shape: f32[1,128], index: 4, kind: input, shape index: {}]   ;;  %s1656_s6 = inlined_call_operand.vmem [shape: f32[1,128], index: 6, kind: input, shape index: {}]   ;;  %s1657_s7 = inlined_call_operand.vmem [shape: f32[8,128], index: 7, kind: output, shape index: {}]  }
   0x1   :  { %v1125_v0 = vld [vmem:[%s1650_s1 + $0x74] ss:$8 sps:$4 sm:$0xff]   ;;  %v1127_v1 = vld [vmem:[%s1650_s1 + $0x70] ss:$8 sps:$4 sm:$0xff]   ;;  %v1131_v4 = vld [vmem:[%s1650_s1 + $0x64] ss:$8 sps:$4 sm:$0xff]  }
   0x2   :  { %540 = vmatprep.subr.bf16.mxu0 %v1125_v0  ;;  %v1128_v2 = vld [vmem:[%s1650_s1 + $0x174] ss:$8 sps:$4 sm:$0xff]   ;;  %v1130_v3 = vld [vmem:[%s1650_s1 + $0x170] ss:$8 sps:$4 sm:$0xff]   ;;  %v1133_v5 = vld [vmem:[%s1650_s1 + $0x60] ss:$8 sps:$4 sm:$0xff]  }
   0x3   :  { %541 = vmatpush1.bf16.msra.mxu0 %v1127_v1  ;;  %581 = vmatprep.subr.bf16.mxu1 %v1128_v2  ;;  %v1134_v6 = vld [vmem:[%s1650_s1 + $0x164] ss:$8 sps:$4 sm:$0xff]   ;;  %v1136_v7 = vld [vmem:[%s1650_s1 + $0x160] ss:$8 sps:$4 sm:$0xff]   ;;  %v1137_v8 = vld [vmem:[%s1650_s1 + $0x54] ss:$8 sps:$4 sm:$0xff]  }
   0x4   :  { %582 = vmatpush1.bf16.msra.mxu1 %v1130_v3  ;;  %542 = vmatprep.subr.bf16.mxu0 %v1131_v4  ;;  %v1139_v9 = vld [vmem:[%s1650_s1 + $0x50] ss:$8 sps:$4 sm:$0xff]   ;;  %v1140_v10 = vld [vmem:[%s1650_s1 + $0x154] ss:$8 sps:$4 sm:$0xff]   ;;  %v1143_v11 = vld [vmem:[%s1650_s1 + $0x44] ss:$8 sps:$4 sm:$0xff]  }
   0x5   :  { %583 = vmatprep.subr.bf16.mxu1 %v1134_v6  ;;  %v1142_v12 = vld [vmem:[%s1650_s1 + $0x150] ss:$8 sps:$4 sm:$0xff]   ;;  %v1146_v13 = vld [vmem:[%s1650_s1 + $0x144] ss:$8 sps:$4 sm:$0xff]   ;;  %v1145_v14 = vld [vmem:[%s1650_s1 + $0x40] ss:$8 sps:$4 sm:$0xff]  }
   0x6   :  { %v1149_v15 = vld [vmem:[%s1650_s1 + $0x34] ss:$8 sps:$4 sm:$0xff]   ;;  %v1148_v16 = vld [vmem:[%s1650_s1 + $0x140] ss:$8 sps:$4 sm:$0xff]   ;;  %v1151_v18 = vld [vmem:[%s1650_s1 + $0x30] ss:$8 sps:$4 sm:$0xff]  }
   0x7   :  { %543 = vmatpush1.bf16.msra.mxu0 %v1133_v5  ;;  %v1152_v17 = vld [vmem:[%s1650_s1 + $0x134] ss:$8 sps:$4 sm:$0xff]   ;;  %v1155_v19 = vld [vmem:[%s1650_s1 + $0x24] ss:$8 sps:$4 sm:$0xff]   ;;  %v1154_v20 = vld [vmem:[%s1650_s1 + $0x130] ss:$8 sps:$4 sm:$0xff]  }
   0x8   :  { %544 = vmatprep.subr.bf16.mxu0 %v1137_v8  ;;  %584 = vmatpush1.bf16.msra.mxu1 %v1136_v7  ;;  %v1158_v21 = vld [vmem:[%s1650_s1 + $0x124] ss:$8 sps:$4 sm:$0xff]   ;;  %v1157_v22 = vld [vmem:[%s1650_s1 + $0x20] ss:$8 sps:$4 sm:$0xff]   ;;  %v1161_v23 = vld [vmem:[%s1650_s1 + $0x14] ss:$8 sps:$4 sm:$0xff]  }
   0x9   :  { %585 = vmatprep.subr.bf16.mxu1 %v1140_v10  ;;  %v1160_v24 = vld [vmem:[%s1650_s1 + $0x120] ss:$8 sps:$4 sm:$0xff]   ;;  %v1164_v25 = vld [vmem:[%s1650_s1 + $0x114] ss:$8 sps:$4 sm:$0xff]   ;;  %v1163_v26 = vld [vmem:[%s1650_s1 + $0x10] ss:$8 sps:$4 sm:$0xff]  }
   0xa   :  { %v1167_v27 = vld [vmem:[%s1650_s1 + $0x4] ss:$8 sps:$4 sm:$0xff]   ;;  %v1166_v28 = vld [vmem:[%s1650_s1 + $0x110] ss:$8 sps:$4 sm:$0xff]   ;;  %v1169_v30 = vld [vmem:[%s1650_s1] ss:$8 sps:$4 sm:$0xff]  }
   0xb   :  { %545 = vmatpush1.bf16.msra.mxu0 %v1139_v9  ;;  %v1170_v29 = vld [vmem:[%s1650_s1 + $0x104] ss:$8 sps:$4 sm:$0xff]   ;;  %v1173_v31 = vld [vmem:[%s1650_s1 + $0xf4] ss:$8 sps:$4 sm:$0xff]   ;;  %v1172_v32 = vld [vmem:[%s1650_s1 + $0x100] ss:$8 sps:$4 sm:$0xff]  }
   0xc   :  { %546 = vmatprep.subr.bf16.mxu0 %v1143_v11  ;;  %586 = vmatpush1.bf16.msra.mxu1 %v1142_v12  ;;  %v1176_v33 = vld [vmem:[%s1650_s1 + $0x1f4] ss:$8 sps:$4 sm:$0xff]   ;;  %v1175_v34 = vld [vmem:[%s1650_s1 + $0xf0] ss:$8 sps:$4 sm:$0xff]   ;;  %v1179_v35 = vld [vmem:[%s1650_s1 + $0xe4] ss:$8 sps:$4 sm:$0xff]  }
   0xd   :  { %587 = vmatprep.subr.bf16.mxu1 %v1146_v13  ;;  %v1178_v36 = vld [vmem:[%s1650_s1 + $0x1f0] ss:$8 sps:$4 sm:$0xff]   ;;  %v1182_v37 = vld [vmem:[%s1650_s1 + $0x1e4] ss:$8 sps:$4 sm:$0xff]   ;;  %v1181_v38 = vld [vmem:[%s1650_s1 + $0xe0] ss:$8 sps:$4 sm:$0xff]  }
   0xe   :  { %v1185_v39 = vld [vmem:[%s1650_s1 + $0xd4] ss:$8 sps:$4 sm:$0xff]   ;;  %v1184_v40 = vld [vmem:[%s1650_s1 + $0x1e0] ss:$8 sps:$4 sm:$0xff]   ;;  %v1187_v42 = vld [vmem:[%s1650_s1 + $0xd0] ss:$8 sps:$4 sm:$0xff]  }
   0xf   :  { %547 = vmatpush1.bf16.msra.mxu0 %v1145_v14  ;;  %v1188_v41 = vld [vmem:[%s1650_s1 + $0x1d4] ss:$8 sps:$4 sm:$0xff]   ;;  %v1191_v43 = vld [vmem:[%s1650_s1 + $0xc4] ss:$8 sps:$4 sm:$0xff]   ;;  %v1190_v44 = vld [vmem:[%s1650_s1 + $0x1d0] ss:$8 sps:$4 sm:$0xff]  }
  0x10   :  { %548 = vmatprep.subr.bf16.mxu0 %v1149_v15  ;;  %588 = vmatpush1.bf16.msra.mxu1 %v1148_v16  ;;  %v1194_v45 = vld [vmem:[%s1650_s1 + $0x1c4] ss:$8 sps:$4 sm:$0xff]   ;;  %v1193_v47 = vld [vmem:[%s1650_s1 + $0xc0] ss:$8 sps:$4 sm:$0xff]   ;;  %v1197_v50 = vld [vmem:[%s1650_s1 + $0xb4] ss:$8 sps:$4 sm:$0xff]  }
  0x11   :  { %589 = vmatprep.subr.bf16.mxu1 %v1152_v17  ;;  %v27_v46 = vld [vmem:[%s1651_s0] sm:$0xff]  ;;  %v28_v51 = vld [vmem:[%s1651_s0 + $0x8] sm:$0xff]  ;;  %v1200_v52 = vld [vmem:[%s1650_s1 + $0x1b4] ss:$8 sps:$4 sm:$0xff]   ;;  %v1274_v10 = vmov 0  }
  0x12   :  { %v961_v48 = vcombine.high %v27_v46, %v27_v46  ;;  %v1196_v49 = vld [vmem:[%s1650_s1 + $0x1c0] ss:$8 sps:$4 sm:$0xff]   ;;  %v963_v53 = vcombine.high %v28_v51, %v28_v51  ;;  %v1199_v54 = vld [vmem:[%s1650_s1 + $0xb0] ss:$8 sps:$4 sm:$0xff]   ;;  %v1203_v55 = vld [vmem:[%s1650_s1 + $0xa4] ss:$8 sps:$4 sm:$0xff]   ;;  %v960_v5 = vcombine.low %v27_v46, %v27_v46  ;;  %v962_v7 = vcombine.low %v28_v51, %v28_v51 }
  0x13   :  { %549 = vmatpush1.bf16.msra.mxu0 %v1151_v18  ;;  %v1202_v56 = vld [vmem:[%s1650_s1 + $0x1b0] ss:$8 sps:$4 sm:$0xff]   ;;  %v1206_v57 = vld [vmem:[%s1650_s1 + $0x1a4] ss:$8 sps:$4 sm:$0xff]   ;;  %v1205_v58 = vld [vmem:[%s1650_s1 + $0xa0] ss:$8 sps:$4 sm:$0xff]  }
  0x14   :  { %550 = vmatprep.subr.bf16.mxu0 %v1155_v19  ;;  %590 = vmatpush1.bf16.msra.mxu1 %v1154_v20  ;;  %v1209_v59 = vld [vmem:[%s1650_s1 + $0x94] ss:$8 sps:$4 sm:$0xff]   ;;  %v1208_v60 = vld [vmem:[%s1650_s1 + $0x1a0] ss:$8 sps:$4 sm:$0xff]   ;;  %v1211_v62 = vld [vmem:[%s1650_s1 + $0x90] ss:$8 sps:$4 sm:$0xff]  }
  0x15   :  { %591 = vmatprep.subr.bf16.mxu1 %v1158_v21  ;;  %572 = vmatprep.mubr.bf16.mxu0 %v961_v48  ;;  %v1212_v61 = vld [vmem:[%s1650_s1 + $0x194] ss:$8 sps:$4 sm:$0xff]   ;;  %v1215_v63 = vld [vmem:[%s1650_s1 + $0x84] ss:$8 sps:$4 sm:$0xff]   ;;  %v1214_v0 = vld [vmem:[%s1650_s1 + $0x190] ss:$8 sps:$4 sm:$0xff]  }
  0x16   :  { %613 = vmatprep.mubr.bf16.mxu1 %v963_v53  ;;  %v1218_v1 = vld [vmem:[%s1650_s1 + $0x184] ss:$8 sps:$4 sm:$0xff]   ;;  %v1217_v2 = vld [vmem:[%s1650_s1 + $0x80] ss:$8 sps:$4 sm:$0xff]   ;;  %v1226_v3 = vld [vmem:[%s1650_s1 + $0x274] ss:$8 sps:$4 sm:$0xff]  }
  0x17   :  { %551 = vmatpush1.bf16.msra.mxu0 %v1157_v22  ;;  %v1223_v4 = vld [vmem:[%s1650_s1 + $0x180] ss:$8 sps:$4 sm:$0xff]   ;;  %v1224_v6 = vld [vmem:[%s1650_s1 + $0x270] ss:$8 sps:$4 sm:$0xff]   ;;  %v1231_v8 = vld [vmem:[%s1650_s1 + $0x264] ss:$8 sps:$4 sm:$0xff]  }
  0x18   :  { %552 = vmatprep.subr.bf16.mxu0 %v1161_v23  ;;  %592 = vmatpush1.bf16.msra.mxu1 %v1160_v24  ;;  %v1229_v9 = vld [vmem:[%s1650_s1 + $0x260] ss:$8 sps:$4 sm:$0xff]   ;;  %v1234_v11 = vld [vmem:[%s1650_s1 + $0x254] ss:$8 sps:$4 sm:$0xff]   ;;  %v1232_v12 = vld [vmem:[%s1650_s1 + $0x250] ss:$8 sps:$4 sm:$0xff]  }
  0x19   :  { %593 = vmatprep.subr.bf16.mxu1 %v1164_v25  ;;  %v1237_v13 = vld [vmem:[%s1650_s1 + $0x244] ss:$8 sps:$4 sm:$0xff]   ;;  %v1235_v14 = vld [vmem:[%s1650_s1 + $0x240] ss:$8 sps:$4 sm:$0xff]   ;;  %v1240_v15 = vld [vmem:[%s1650_s1 + $0x234] ss:$8 sps:$4 sm:$0xff]  }
  0x1a   :  { %v1238_v16 = vld [vmem:[%s1650_s1 + $0x230] ss:$8 sps:$4 sm:$0xff]   ;;  %v1243_v17 = vld [vmem:[%s1650_s1 + $0x224] ss:$8 sps:$4 sm:$0xff]   ;;  %v1241_v18 = vld [vmem:[%s1650_s1 + $0x220] ss:$8 sps:$4 sm:$0xff]  }
  0x1b   :  { %553 = vmatpush1.bf16.msra.mxu0 %v1163_v26  ;;  %v1246_v19 = vld [vmem:[%s1650_s1 + $0x214] ss:$8 sps:$4 sm:$0xff]   ;;  %v1244_v20 = vld [vmem:[%s1650_s1 + $0x210] ss:$8 sps:$4 sm:$0xff]   ;;  %v1249_v21 = vld [vmem:[%s1650_s1 + $0x204] ss:$8 sps:$4 sm:$0xff]  }
  0x1c   :  { %554 = vmatprep.subr.bf16.mxu0 %v1167_v27  ;;  %594 = vmatpush1.bf16.msra.mxu1 %v1166_v28  ;;  %v1247_v22 = vld [vmem:[%s1650_s1 + $0x200] ss:$8 sps:$4 sm:$0xff]   ;;  %v1222_v23 = vld [vmem:[%s1651_s0 + $0x10] ss:$0 sps:$4 sm:$0xff]   ;;  %v1250_v24 = vld [vmem:[%s1652_s3 + $0x78] sm:$0xff]  }
  0x1d   :  { %595 = vmatprep.subr.bf16.mxu1 %v1170_v29  ;;  %v1251_v25 = vld [vmem:[%s1652_s3 + $0x38] sm:$0xff]   ;;  %v1252_v26 = vld [vmem:[%s1652_s3 + $0x70] sm:$0xff]   ;;  %v1254_v28 = vld [vmem:[%s1652_s3 + $0x68] sm:$0xff]  }
  0x1e   :  { %v1253_v27 = vld [vmem:[%s1652_s3 + $0x30] sm:$0xff]   ;;  %v1255_v29 = vld [vmem:[%s1652_s3 + $0x28] sm:$0xff]  }
  0x1f   :  { %555 = vmatpush1.bf16.msra.mxu0 %v1169_v30  ;;  %v1256_v30 = vld [vmem:[%s1652_s3 + $0x60] sm:$0xff]  }
  0x20   :  { %556 = vmatprep.subr.bf16.mxu0 %v1173_v31  ;;  %596 = vmatpush1.bf16.msra.mxu1 %v1172_v32  ;;  %v1257_v31 = vld [vmem:[%s1652_s3 + $0x20] sm:$0xff]   ;;  %v1258_v32 = vld [vmem:[%s1652_s3 + $0x58] sm:$0xff]  }
  0x21   :  { %597 = vmatprep.subr.bf16.mxu1 %v1176_v33  ;;  %v1259_v33 = vld [vmem:[%s1652_s3 + $0x18] sm:$0xff]  }
  0x23   :  { %557 = vmatpush2.bf16.msra.mxu0 %v1175_v34  ;;  %v1260_v34 = vld [vmem:[%s1652_s3 + $0x50] sm:$0xff]  }
  0x24   :  { %558 = vmatprep.subr.bf16.mxu0 %v1179_v35  ;;  %598 = vmatpush2.bf16.msra.mxu1 %v1178_v36  ;;  %v1261_v35 = vld [vmem:[%s1652_s3 + $0x10] sm:$0xff]   ;;  %v1262_v36 = vld [vmem:[%s1652_s3 + $0x48] sm:$0xff]  }
  0x25   :  { %599 = vmatprep.subr.bf16.mxu1 %v1182_v37  ;;  %v1263_v37 = vld [vmem:[%s1652_s3 + $0x8] sm:$0xff]  }
  0x27   :  { %559 = vmatpush2.bf16.msra.mxu0 %v1181_v38  ;;  %v1264_v38 = vld [vmem:[%s1652_s3 + $0x40] sm:$0xff]  }
  0x28   :  { %560 = vmatprep.subr.bf16.mxu0 %v1185_v39  ;;  %600 = vmatpush2.bf16.msra.mxu1 %v1184_v40  ;;  %v1265_v39 = vld [vmem:[%s1652_s3] sm:$0xff]   ;;  %v1275_v40 = vmov 0.0  }
  0x29   :  { %601 = vmatprep.subr.bf16.mxu1 %v1188_v41  ;;  %v1266_v41 = vld [vmem:[%s1653_s5 + $0x38] sm:$0xff]  }
  0x2b   :  { %561 = vmatpush2.bf16.msra.mxu0 %v1187_v42  ;;  %v1267_v42 = vld [vmem:[%s1653_s5 + $0x30] sm:$0xff]  }
  0x2c   :  { %562 = vmatprep.subr.bf16.mxu0 %v1191_v43  ;;  %602 = vmatpush2.bf16.msra.mxu1 %v1190_v44  ;;  %v1268_v43 = vld [vmem:[%s1653_s5 + $0x28] sm:$0xff]   ;;  %v1269_v44 = vld [vmem:[%s1653_s5 + $0x20] sm:$0xff]  }
  0x2d   :  { %603 = vmatprep.subr.bf16.mxu1 %v1194_v45  ;;  %v1270_v45 = vld [vmem:[%s1653_s5 + $0x18] sm:$0xff]  }
  0x2f   :  { %563 = vmatpush2.bf16.msra.mxu0 %v1193_v47 }
  0x30   :  { %564 = vmatprep.subr.bf16.mxu0 %v1197_v50  ;;  %604 = vmatpush2.bf16.msra.mxu1 %v1196_v49 }
  0x31   :  { %605 = vmatprep.subr.bf16.mxu1 %v1200_v52 }
  0x33   :  { %565 = vmatpush2.bf16.msra.mxu0 %v1199_v54  ;;  %v112_v54 = vlaneseq }
  0x34   :  { %566 = vmatprep.subr.bf16.mxu0 %v1203_v55  ;;  %606 = vmatpush2.bf16.msra.mxu1 %v1202_v56 }
  0x35   :  { %607 = vmatprep.subr.bf16.mxu1 %v1206_v57  ;;  %v113_v55 = vshrl.u32 %v112_v54, 7  ;;  %v110_v57 = vld [vmem:[%s1654_s2] sm:$0x3] }
  0x37   :  { %567 = vmatpush2.bf16.msra.mxu0 %v1205_v58  ;;  %v114_v56 = vsub.s32 0, %v113_v55  ;;  %v118_v58 = vsub.s32 1, %v113_v55 }
  0x38   :  { %568 = vmatprep.subr.bf16.mxu0 %v1209_v59  ;;  %608 = vmatpush2.bf16.msra.mxu1 %v1208_v60 }
  0x39   :  { %609 = vmatprep.subr.bf16.mxu1 %v1212_v61  ;;  %v115_v59 = vrot.slane %v110_v57, %v114_v56  ;;  %v119_v60 = vrot.slane %v110_v57, %v118_v58 }
  0x3b   :  { %569 = vmatpush2.bf16.msra.mxu0 %v1211_v62 }
  0x3c   :  { %570 = vmatprep.subr.bf16.mxu0 %v1215_v63  ;;  %610 = vmatpush2.bf16.msra.mxu1 %v1214_v0 }
  0x3d   :  { %611 = vmatprep.subr.bf16.mxu1 %v1218_v1 }
  0x3f   :  { %571 = vmatpush2.bf16.msra.mxu0 %v1217_v2 }
  0x40   :  { %622 = vmatprep.subr.bf16.mxu0 %v1226_v3  ;;  %612 = vmatpush2.bf16.msra.mxu1 %v1223_v4 }
  0x41   :  { %1071 = vmatprep.subr.bf16.mxu1 %v1250_v24 }
  0x42   :  { %573 = vmatmul.mubr.bf16.vlgmr.msra.gmra.mxu0 %v960_v5 }
  0x43   :  { %623 = vmatpush1.bf16.msra.mxu0 %v1224_v6  ;;  %654 = vmatprep.mubr.bf16.mxu0 %v1274_v10 }
  0x44   :  { %614 = vmatmul.mubr.bf16.vlgmr.msra.gmra.mxu1 %v962_v7  ;;  %624 = vmatprep.subr.bf16.mxu0 %v1231_v8 }
  0x45   :  { %1072 = vmatpush3.bf16.msra.mxu1 %v1251_v25 }
  0x46   :  { %1073 = vmatprep.subr.bf16.mxu1 %v1252_v26 }
  0x47   :  { %625 = vmatpush1.bf16.msra.mxu0 %v1229_v9 }
  0x48   :  { %626 = vmatprep.subr.bf16.mxu0 %v1234_v11  ;;  %v1271_v11 = vld [vmem:[%s1653_s5 + $0x10] sm:$0xff]  }
  0x49   :  { %1074 = vmatpush3.bf16.msra.mxu1 %v1253_v27 }
  0x4a   :  { %1075 = vmatprep.subr.bf16.mxu1 %v1254_v28 }
  0x4b   :  { %627 = vmatpush1.bf16.msra.mxu0 %v1232_v12  ;;  %v1272_v12 = vld [vmem:[%s1653_s5 + $0x8] sm:$0xff]  }
  0x4c   :  { %628 = vmatprep.subr.bf16.mxu0 %v1237_v13  ;;  %v1273_v13 = vld [vmem:[%s1653_s5] sm:$0xff]  }
  0x4d   :  { %1076 = vmatpush3.bf16.msra.mxu1 %v1255_v29 }
  0x4e   :  { %1077 = vmatprep.subr.bf16.mxu1 %v1256_v30 }
  0x4f   :  { %629 = vmatpush1.bf16.msra.mxu0 %v1235_v14 }
  0x50   :  { %630 = vmatprep.subr.bf16.mxu0 %v1240_v15  ;;  %v1045_v15 = vld [vmem:[%s1655_s4] ss:$0 sm:$0xff] }
  0x51   :  { %1078 = vmatpush3.bf16.msra.mxu1 %v1257_v31 }
  0x52   :  { %1079 = vmatprep.subr.bf16.mxu1 %v1258_v32 }
  0x53   :  { %631 = vmatpush1.bf16.msra.mxu0 %v1238_v16 }
  0x54   :  { %632 = vmatprep.subr.bf16.mxu0 %v1243_v17 }
  0x55   :  { %1080 = vmatpush3.bf16.msra.mxu1 %v1259_v33 }
  0x56   :  { %1081 = vmatprep.subr.bf16.mxu1 %v1260_v34 }
  0x57   :  { %633 = vmatpush1.bf16.msra.mxu0 %v1241_v18 }
  0x58   :  { %634 = vmatprep.subr.bf16.mxu0 %v1246_v19 }
  0x59   :  { %1082 = vmatpush3.bf16.msra.mxu1 %v1261_v35 }
  0x5a   :  { %1083 = vmatprep.subr.bf16.mxu1 %v1262_v36 }
  0x5b   :  { %635 = vmatpush1.bf16.msra.mxu0 %v1244_v20 }
  0x5c   :  { %636 = vmatprep.subr.bf16.mxu0 %v1249_v21 }
  0x5d   :  { %1084 = vmatpush3.bf16.msra.mxu1 %v1263_v37 }
  0x5e   :  { %1085 = vmatprep.subr.bf16.mxu1 %v1264_v38 }
  0x5f   :  { %637 = vmatpush1.bf16.msra.mxu0 %v1247_v22 }
  0x60   :  { %1102 = vmatprep.subr.bf16.mxu0 %v1275_v40 }
  0x61   :  { %1086 = vmatpush3.bf16.msra.mxu1 %v1265_v39 }
  0x62   :  { %655 = vmatmul.mubr.bf16.vlgmr.msra.gmra.mxu0 %v1222_v23  ;;  %v1062_v23 = vld [vmem:[%s1656_s6] ss:$0 sm:$0xff] }
  0x63   :  { %1103 = vmatpush3.bf16.msra.mxu0 %v1266_v41  ;;  %1118 = vmatprep.mubr.msk.bf16.mxu0 %vm1276_vm0, %v1275_v40 }
  0x64   :  { %1104 = vmatprep.subr.bf16.mxu0 %v1275_v40 }
  0x67   :  { %1105 = vmatpush3.bf16.msra.mxu0 %v1267_v42 }
  0x68   :  { %1106 = vmatprep.subr.bf16.mxu0 %v1275_v40 }
  0x6b   :  { %1107 = vmatpush3.bf16.msra.mxu0 %v1268_v43 }
  0x6c   :  { %1108 = vmatprep.subr.bf16.mxu0 %v1275_v40 }
  0x6f   :  { %1109 = vmatpush3.bf16.msra.mxu0 %v1269_v44 }
  0x70   :  { %1110 = vmatprep.subr.bf16.mxu0 %v1275_v40 }
  0x73   :  { %1111 = vmatpush3.bf16.msra.mxu0 %v1270_v45 }
  0x74   :  { %1112 = vmatprep.subr.bf16.mxu0 %v1275_v40 }
  0x77   :  { %1113 = vmatpush3.bf16.msra.mxu0 %v1271_v11 }
  0x78   :  { %1114 = vmatprep.subr.bf16.mxu0 %v1275_v40 }
  0x7b   :  { %1115 = vmatpush3.bf16.msra.mxu0 %v1272_v12 }
  0x7c   :  { %1116 = vmatprep.subr.bf16.mxu0 %v1275_v40 }
  0x7f   :  { %1117 = vmatpush3.bf16.msra.mxu0 %v1273_v13 }
 0x102   :  { %v574_v46 = vpop.f32.mrf.mxu0 }
 0x103   :  { %v575_v61 = vadd.f32 %v574_v46, %v115_v59 }
 0x104   :  { %v576_v47 = vpop.f32.mrf.mxu0  ;;  %v615_v48 = vpop.f32.mrf.mxu1 }
 0x105   :  { %v577_v62 = vadd.f32 %v576_v47, %v119_v60  ;;  %v616_v63 = vadd.f32 %v615_v48, %v575_v61 }
 0x106   :  { %v578_v49 = vpop.f32.mrf.mxu0  ;;  %v617_v50 = vpop.f32.mrf.mxu1 }
 0x107   :  { %v618_v1 = vadd.f32 %v617_v50, %v577_v62 }
 0x108   :  { %v579_v51 = vpop.f32.mrf.mxu0  ;;  %v619_v52 = vpop.f32.mrf.mxu1 }
 0x10a   :  { %v620_v53 = vpop.f32.mrf.mxu1 }
 0x122   :  { %v656_v0 = vpop.f32.mrf.mxu0 }
 0x123   :  { %v657_v2 = vadd.f32 %v656_v0, %v616_v63 }
 0x124   :  { %v658_v3 = vpop.f32.mrf.mxu0 }
 0x125   :  { %v659_v4 = vadd.f32 %v658_v3, %v618_v1  ;;  %v663_v5 = vmax.f32 %v657_v2, 0.0 }
 0x126   :  { %v660_v6 = vpop.f32.mrf.mxu0 }
 0x127   :  { %v664_v7 = vmax.f32 %v659_v4, 0.0  ;;  %v665_v10 = vpack.c.bf16 %v663_v5, %v663_v5 }
 0x128   :  { %v661_v8 = vpop.f32.mrf.mxu0 }
 0x129   :  { %v666_v9 = vpack.c.bf16 %v664_v7, %v664_v7 }
 0x12b   :  { %834 = vmatprep.mubr.bf16.mxu1 %v666_v9 }
 0x12c   :  { %835 = vmatmul.mubr.bf16.vlgmr.msra.gmra.mxu1 %v665_v10 }
 0x1ec   :  { %v1087_v14 = vpop.f32.mrf.mxu1 }
 0x1ee   :  { %v1088_v16 = vpop.f32.mrf.mxu1 }
 0x1ef   :  { %v1089_v17 = vadd.f32 %v1088_v16, %v1087_v14 }
 0x1f0   :  { %v1090_v18 = vpop.f32.mrf.mxu1 }
 0x1f1   :  { %v837_v19 = vadd.f32 %v1089_v17, %v1045_v15 }
 0x1f2   :  { %v1091_v20 = vpop.f32.mrf.mxu1 }
 0x1f3   :  { %v842_v21 = vmax.f32 %v837_v19, 0.0 }
 0x1f5   :  { %v843_v22 = vpack.c.bf16 %v842_v21, %v842_v21 }
 0x1f7   :  { %1119 = vmatmul.mubr.bf16.vlgmr.msra.gmra.mxu0 %v843_v22 }
 0x2b7   :  { %v949_v24 = vpop.f32.mrf.mxu0 }
 0x2b8   :  { %v950_v25 = vadd.f32 %v1062_v23, %v949_v24 }
 0x2b9   :  { %v1120_v26 = vpop.f32.mrf.mxu0 }
 0x2ba   :  { %955 = vst [vmem:[%s1657_s7] sm:$0xff] %v950_v25 }
 0x2bb   :  { %v952_v27 = vpop.f32.mrf.mxu0 }
 0x2bd   :  { %v1121_v28 = vpop.f32.mrf.mxu0 }

</bundles_post_ra>
